<compile_context>
chip_gen: v6e
topology: v6e:2x2x1
jax: 0.10.0
libtpu: 0.0.40
codegen_flags: <defaults>
</compile_context>

<pallas_src>
import jax
import jax.numpy as jnp
from jax.experimental import pallas as pl
from jax.experimental.pallas import tpu as pltpu

LANES = 128
SUBLANES = 8


def logreg_kernel(w_ref, b_ref, x_ref, o_ref):
    # w_ref: (D,) f32 SMEM, b_ref: (1,) f32 SMEM,
    # x_ref: (D, R, 128) f32 VMEM (feature-major, sublane/lane-dense),
    # o_ref: (R, 128) f32 VMEM.
    z = jnp.full(o_ref.shape, b_ref[0], dtype=jnp.float32)   # init from bias (no zeros+add)
    for d in range(x_ref.shape[0]):                           # D tiny & static -> unrolled VPU FMAs
        z = z + w_ref[d] * x_ref[d]                           # per-feature (R,128) strip from the ref
    # Exact sigmoid with a single EUP push: sigmoid(z) = 0.5*tanh(0.5*z) + 0.5.
    o_ref[...] = (0.5 * jnp.tanh(0.5 * z) + 0.5).astype(o_ref.dtype)


def logistic_regression_forward(x, weight, bias, *, block_rows=2048):
    """x: [N, D] f32, weight: [1, D] f32 (PyTorch nn.Linear layout), bias: [1] f32 -> [N, 1] f32.

    NOTE: the VPU reduction over D targets the small-feature logistic-regression case
    (D = 2 here). For D in the hundreds+ a K-tiled MXU variant with a VMEM f32
    accumulator (pl.when init / finalize) would be the better choice.
    """
    N, D = x.shape
    block_rows = max(SUBLANES, (block_rows // SUBLANES) * SUBLANES)

    # Sublane/lane-dense row count: rows of 128 samples, rounded to a multiple of 8.
    rows = pl.cdiv(N, LANES)
    rows = pl.cdiv(rows, SUBLANES) * SUBLANES

    # Tile rows: multiple of 8; keep the grid >= 2 steps when there is enough work so the
    # "parallel" axis can split across v7x's two TensorCores.
    if rows <= SUBLANES:
        tile_rows = SUBLANES
    elif rows <= block_rows:
        tile_rows = pl.cdiv(pl.cdiv(rows, 2), SUBLANES) * SUBLANES
    else:
        tile_rows = block_rows
    rows_pad = pl.cdiv(rows, tile_rows) * tile_rows
    n_pad = rows_pad * LANES
    grid = (rows_pad // tile_rows,)

    # One fused XLA copy: cast + transpose + pad + reshape straight into the
    # (D, rows_pad, 128) feature-major layout the kernel consumes.
    x_t = jnp.pad(x.astype(jnp.float32).T, ((0, 0), (0, n_pad - N))).reshape(D, rows_pad, LANES)
    w_flat = weight.astype(jnp.float32).reshape(-1)   # (D,)  PyTorch layout needs no transpose
    b_flat = bias.astype(jnp.float32).reshape(-1)     # (1,)

    out = pl.pallas_call(
        logreg_kernel,
        out_shape=jax.ShapeDtypeStruct((rows_pad, LANES), jnp.float32),
        grid_spec=pltpu.PrefetchScalarGridSpec(
            num_scalar_prefetch=0,
            grid=grid,
            in_specs=[
                pl.BlockSpec(memory_space=pltpu.MemorySpace.SMEM),          # weight scalars
                pl.BlockSpec(memory_space=pltpu.MemorySpace.SMEM),          # bias scalar
                pl.BlockSpec((D, tile_rows, LANES), lambda i: (0, i, 0)),   # x tile, (8,128)-dense
            ],
            out_specs=pl.BlockSpec((tile_rows, LANES), lambda i: (i, 0)),   # (8,128)-dense output
        ),
        compiler_params=pltpu.CompilerParams(
            dimension_semantics=("parallel",),   # independent batch tiles -> v7x megacore
        ),
    )(w_flat, b_flat, x_t)

    # Padded tail columns hold sigmoid(bias); slice them off before returning.
    return out.reshape(-1)[:N].reshape(N, 1)


if __name__ == "__main__":
    # Data matching the module's usage: X has 2 columns -> input_dim = 2.
    X = jnp.array(
        [[0.5, 1.0], [0.75, 1.0], [1.0, 1.0], [1.25, 0.0], [1.5, 0.0],
         [1.75, 0.0], [2.0, 0.0], [2.25, 1.0], [2.5, 0.0], [2.75, 1.0]],
        dtype=jnp.float32,
    )
    input_dim = X.shape[1]

    # Deterministic parameter init (mirrors nn.Linear's U(-1/sqrt(D), 1/sqrt(D))).
    key = jax.random.PRNGKey(0)
    kw, kb, kx = jax.random.split(key, 3)
    bound = 1.0 / (input_dim ** 0.5)
    weight = jax.random.uniform(kw, (1, input_dim), jnp.float32, -bound, bound)
    bias = jax.random.uniform(kb, (1,), jnp.float32, -bound, bound)

    out = logistic_regression_forward(X, weight, bias)
    jax.block_until_ready(out)

    # Reference check in plain JAX (sigmoid is exact now).
    ref = jax.nn.sigmoid(X @ weight.T + bias)
    assert out.shape == (X.shape[0], 1), out.shape
    assert jnp.allclose(out, ref, atol=1e-5, rtol=1e-5), (out, ref)

    # Secondary check exercising the multi-tile (grid >= 2) path with padding.
    X2 = jax.random.uniform(kx, (2000, input_dim), jnp.float32, 0.0, 3.0)
    out2 = logistic_regression_forward(X2, weight, bias)
    jax.block_until_ready(out2)
    ref2 = jax.nn.sigmoid(X2 @ weight.T + bias)
    assert out2.shape == (2000, 1), out2.shape
    assert jnp.allclose(out2, ref2, atol=1e-5, rtol=1e-5)

    print("KERNEL_OK")
</pallas_src>

<mosaic_0001>
module attributes {stable_mosaic.version = 11 : i64} {
  func.func @logreg_kernel(%arg0: i32, %arg1: memref<2xf32, #tpu.memory_space<smem>>, %arg2: memref<1xf32, #tpu.memory_space<smem>>, %arg3: memref<2x8x128xf32, #tpu.memory_space<vmem>>, %arg4: memref<8x128xf32, #tpu.memory_space<vmem>>) attributes {dimension_semantics = [#tpu.dimension_semantics<parallel>], iteration_bounds = array<i64: 1>, scalar_prefetch = 0 : i64, scratch_operands = 0 : i64, tpu.core_type = #tpu.core_type<tc>, window_params = [{transform_indices = @transform_0, window_bounds = array<i64: 2>}, {transform_indices = @transform_1, window_bounds = array<i64: 1>}, {transform_indices = @transform_2, window_bounds = array<i64: 2, 8, 128>}, {transform_indices = @transform_3, window_bounds = array<i64: 8, 128>}]} {
    %c0 = arith.constant 0 : index
    %0 = memref.load %arg2[%c0] : memref<1xf32, #tpu.memory_space<smem>>
    %1 = vector.broadcast %0 : f32 to vector<8x128xf32>
    %c0_0 = arith.constant 0 : index
    %2 = memref.load %arg1[%c0_0] : memref<2xf32, #tpu.memory_space<smem>>
    %c0_1 = arith.constant 0 : index
    %c0_2 = arith.constant 0 : index
    %c0_3 = arith.constant 0 : index
    %3 = vector.load %arg3[%c0_1, %c0_2, %c0_3] : memref<2x8x128xf32, #tpu.memory_space<vmem>>, vector<1x8x128xf32>
    %4 = vector.shape_cast %3 : vector<1x8x128xf32> to vector<8x128xf32>
    %5 = vector.broadcast %2 : f32 to vector<8x128xf32>
    %6 = arith.mulf %5, %4 : vector<8x128xf32>
    %7 = arith.addf %1, %6 : vector<8x128xf32>
    %c1 = arith.constant 1 : index
    %8 = memref.load %arg1[%c1] : memref<2xf32, #tpu.memory_space<smem>>
    %c1_4 = arith.constant 1 : index
    %c0_5 = arith.constant 0 : index
    %c0_6 = arith.constant 0 : index
    %9 = vector.load %arg3[%c1_4, %c0_5, %c0_6] : memref<2x8x128xf32, #tpu.memory_space<vmem>>, vector<1x8x128xf32>
    %10 = vector.shape_cast %9 : vector<1x8x128xf32> to vector<8x128xf32>
    %11 = vector.broadcast %8 : f32 to vector<8x128xf32>
    %12 = arith.mulf %11, %10 : vector<8x128xf32>
    %13 = arith.addf %7, %12 : vector<8x128xf32>
    %cst = arith.constant 5.000000e-01 : f32
    %14 = vector.broadcast %cst : f32 to vector<8x128xf32>
    %15 = arith.mulf %14, %13 : vector<8x128xf32>
    %16 = math.tanh %15 : vector<8x128xf32>
    %cst_7 = arith.constant 5.000000e-01 : f32
    %17 = vector.broadcast %cst_7 : f32 to vector<8x128xf32>
    %18 = arith.mulf %17, %16 : vector<8x128xf32>
    %cst_8 = arith.constant 5.000000e-01 : f32
    %19 = vector.broadcast %cst_8 : f32 to vector<8x128xf32>
    %20 = arith.addf %18, %19 : vector<8x128xf32>
    %c0_9 = arith.constant 0 : index
    %c0_10 = arith.constant 0 : index
    %21 = vector.load %arg4[%c0_9, %c0_10] : memref<8x128xf32, #tpu.memory_space<vmem>>, vector<8x128xf32>
    tpu.vector_store %arg4[%c0_9, %c0_10], %20 {strides = array<i32>} : memref<8x128xf32, #tpu.memory_space<vmem>>, vector<8x128xf32>,
    return
  }
  func.func @transform_0(%arg0: i32) -> i32 {
    %c0_i32 = arith.constant 0 : i32
    %c0_i32_0 = arith.constant 0 : i32
    return %c0_i32 : i32
  }
  func.func @transform_1(%arg0: i32) -> i32 {
    %c0_i32 = arith.constant 0 : i32
    %c0_i32_0 = arith.constant 0 : i32
    return %c0_i32 : i32
  }
  func.func @transform_2(%arg0: i32) -> (i32, i32, i32) {
    %c0_i32 = arith.constant 0 : i32
    %c0_i32_0 = arith.constant 0 : i32
    %c0_i32_1 = arith.constant 0 : i32
    return %c0_i32, %arg0, %c0_i32_0 : i32, i32, i32
  }
  func.func @transform_3(%arg0: i32) -> (i32, i32) {
    %c0_i32 = arith.constant 0 : i32
    %c0_i32_0 = arith.constant 0 : i32
    return %arg0, %c0_i32 : i32, i32
  }
}

</mosaic_0001>

<bundles_post_ra>
// kernel: tpu_custom_call.1
= control target key start
LH: loop header
LB: loop body
LE: loop exit
PB: predicated region body
PF: predicated region fallthrough
CT: control target
= control target key end

     0   :  { %9 = vsyncpa [#allocation6], 0  ;;  %s180_s0 = inlined_call_operand.vmem [shape: f32[2], index: 0, kind: input, shape index: {}]   ;;  %s181_s1 = inlined_call_operand.<no memory space> [shape: f32[1], index: 1, kind: input, shape index: {}]   ;;  %s182_s2 = inlined_call_operand.hbm [shape: f32[2,8,128], index: 2, kind: input, shape index: {}]   ;;  %s183_s3 = inlined_call_operand.hbm [shape: f32[8,128], index: 3, kind: output, shape index: {}]  }
   0x1   :  { %10 = vsyncpa [#allocation4], 0 }
   0x2   :  { %11 = vsyncpa [#allocation5], 0  ;;  %s18_s14 = sshll.u32 %s180_s0, 4  ;;  %s19_s14 = int_to_ptr.vmem [resolvable:$true] %s18_s14 }
   0x3   :  { %s85_s15 = scalar_lea.vmem %s19_s14, 16  ;;  %p90_p1 = scmp.lt.s32.totalorder %s19_s14, %s19_s14 }
   0x4   :  { %p86_p0 = scmp.ne.s32.totalorder %s19_s14, %s85_s15  ;;  %p91_p2 = scmp.lt.s32.totalorder %s85_s15, %s85_s15 }
   0x6   :  { %p92_p3 = por %p91_p2, %p90_p1 }
   0x8   :  { %p93_p4 = pnand %p92_p3, %p86_p0 }
   0xa   :  { %96 = shalt.err (!%p93_p4)
}
   0xb   :  { %s143_s16 = smov [#allocation3]   ;;  %s144_s17 = smov [#allocation7]  }
   0xc   :  { %21 = dma.vmem_to_smem %s19_s14, 16, %s143_s16, [#allocation6]  }
   0xd   :  { %s29_s18 = sshll.u32 %s144_s17, 4  ;;  %s30_s18 = int_to_ptr.vmem [resolvable:$true] %s29_s18 }
   0xe   :  { %s105_s19 = scalar_lea.vmem %s30_s18, 256  ;;  %p110_p6 = scmp.lt.s32.totalorder %s30_s18, %s30_s18 }
   0xf   :  { %p106_p5 = scmp.ne.s32.totalorder %s30_s18, %s105_s19  ;;  %p111_p7 = scmp.lt.s32.totalorder %s105_s19, %s105_s19 }
  0x11   :  { %p112_p8 = por %p111_p7, %p110_p6 }
  0x13   :  { %p113_p9 = pnand %p112_p8, %p106_p5 }
  0x15   :  { %116 = shalt.err (!%p113_p9)
}
  0x16   :  { %s145_s0 = smov 128   ;;  %s146_s20 = smov 8  }
  0x17   :  { %35 = dma.hbm_to_vmem [thread:$0]  %s182_s2, 256, %s30_s18, [#allocation4], %s145_s0, %s145_s0, %s146_s20  }
  0x18   :  { %137 = dma.done.wait [#allocation6], 16  }
  0x19   :  { %138 = vsyncadd [#allocation6], 4294967280 }
  0x1a   :  { %139 = dma.done.wait [#allocation4], 256  }
  0x1b   :  { %140 = vsyncadd [#allocation4], 4294967040 }
  0x1c   :  { %42 = sfence }
  0x1d   :  { %s45_s23 = sld [smem:[#allocation3]]  ;;  %v46_v0 = vld [vmem:[#allocation7] sm:$0xff]  ;;  %v52_v1 = vld [vmem:[#allocation7 + $0x8] sm:$0xff]  ;;  %v44_v2 = vstv %s181_s1  ;;  %s147_s2 = smov [#allocation8]  }
  0x1e   :  { %s77_s24 = sld [smem:[#allocation3 + $0x1]]  ;;  %s67_s27 = sshll.u32 %s147_s2, 4  ;;  %s68_s27 = int_to_ptr.vmem [resolvable:$true] %s67_s27 }
  0x1f   :  { %s117_s28 = scalar_lea.vmem %s68_s27, 128  ;;  %p122_p11 = scmp.lt.s32.totalorder %s68_s27, %s68_s27 }
  0x20   :  { %p118_p10 = scmp.ne.s32.totalorder %s68_s27, %s117_s28  ;;  %p123_p12 = scmp.lt.s32.totalorder %s117_s28, %s117_s28 }
  0x22   :  { %p124_p13 = por %p123_p12, %p122_p11 }
  0x23   :  { %v47_v3 = vstv %s45_s23 }
  0x24   :  { %v48_v4 = vmul.f32 %v47_v3, %v46_v0  ;;  %v53_v5 = vstv %s77_s24  ;;  %p125_p0 = pnand %p124_p13, %p118_p10 }
  0x25   :  { %v54_v6 = vmul.f32 %v53_v5, %v52_v1 }
  0x26   :  { %v49_v7 = vadd.f32 %v48_v4, %v44_v2 }
  0x28   :  { %v55_v8 = vadd.f32 %v54_v6, %v49_v7 }
  0x2a   :  { %v56_v9 = vmul.f32 0.5, %v55_v8 }
  0x2c   :  { %83 = vtanh.f32 %v56_v9 }
  0x39   :  { %v84_v10 = vpop.eup %83 }
  0x3a   :  { %v58_v11 = vmul.f32 0.5, %v84_v10 }
  0x3c   :  { %v59_v12 = vadd.f32 0.5, %v58_v11 }
  0x3e   :  { %60 = vst [vmem:[#allocation8] sm:$0xff] %v59_v12 }
  0x3f   :  { %128 = shalt.err (!%p125_p0)
}
  0x40   :  { %70 = dma.vmem_to_hbm [thread:$0]  %s68_s27, 128, %s183_s3, [#allocation5]  }
  0x41   :  { %141 = dma.done.wait [#allocation5], 128  }
  0x42   :  { %142 = vsyncadd [#allocation5], 4294967168 }
  0x43   :  { %74 = vsyncpa [#allocation4], 1 }
  0x44   :  { %75 = vsyncpa [#allocation5], 1 }
  0x45   :  { %76 = vsyncpa [#allocation6], 1 }

</bundles_post_ra>
